<compile_context>
chip_gen: v7x
topology: tpu7x:2x2x1
jax: 0.10.0
libtpu: 0.0.40
codegen_flags: <defaults>
</compile_context>

<pallas_src>
import functools

import jax
import jax.numpy as jnp
from jax.experimental import pallas as pl
from jax.experimental.pallas import tpu as pltpu

LANE = 128
SUBLANE = 8


def _round_up(x, m):
    return (x + m - 1) // m * m


def _asc_head_kernel(x_ref, w1_ref, b1_ref, w2_ref, b2_ref, out_ref):
    """Fused: logits = relu(x @ W1 + b1) @ W2 + b2 (eval-mode dropout = identity).

    All operands are lane-dense (last dim multiple of 128), so both matmuls hit
    the MXU with f32 accumulation and the bias/ReLU run unmasked on the VPU.
    """
    x = x_ref[...]                                             # (TM, D_pad)
    h = jnp.dot(x, w1_ref[...], preferred_element_type=jnp.float32)
    h = jnp.maximum(h + b1_ref[...], 0.0)                      # f32 bias + ReLU
    logits = jnp.dot(h, w2_ref[...], preferred_element_type=jnp.float32)
    out_ref[...] = (logits + b2_ref[...]).astype(out_ref.dtype)


@functools.partial(jax.jit, static_argnames=("block_rows",))
def asc_head_forward(cls_features, w1, b1, w2, b2, *, block_rows=256):
    """cls_features: (B, D); w1: (D, H); b1: (H,); w2: (H, L); b2: (L,)."""
    B, D = cls_features.shape
    H = w1.shape[1]
    L = w2.shape[1]
    dtype = cls_features.dtype

    # Zero-pad feature/label dims to lane width (128) -> unmasked vld/vst, full vregs.
    D_pad = _round_up(D, LANE)
    H_pad = _round_up(H, LANE)
    L_pad = _round_up(L, LANE)

    tiled = B > block_rows
    if tiled:
        TM = block_rows
        B_pad = _round_up(B, TM)
    else:
        TM = B_pad = _round_up(max(B, SUBLANE), SUBLANE)

    # Zero padding is exact: padded x cols / w rows contribute 0 to the dot products,
    # padded bias entries are 0, and padded rows/label-cols are sliced away below.
    x_p = jnp.zeros((B_pad, D_pad), dtype).at[:B, :D].set(cls_features)
    w1_p = jnp.zeros((D_pad, H_pad), w1.dtype).at[:D, :H].set(w1)
    b1_p = jnp.zeros((1, H_pad), b1.dtype).at[0, :H].set(b1)
    w2_p = jnp.zeros((H_pad, L_pad), w2.dtype).at[:H, :L].set(w2)
    b2_p = jnp.zeros((1, L_pad), b2.dtype).at[0, :L].set(b2)

    if not tiled:
        # Single-shot: no grid, no pipeline scaffolding; everything resident in VMEM.
        out_p = pl.pallas_call(
            _asc_head_kernel,
            out_shape=jax.ShapeDtypeStruct((B_pad, L_pad), dtype),
            in_specs=[pl.BlockSpec(memory_space=pltpu.MemorySpace.VMEM)] * 5,
            out_specs=pl.BlockSpec(memory_space=pltpu.MemorySpace.VMEM),
        )(x_p, w1_p, b1_p, w2_p, b2_p)
    else:
        # Large batch: tile rows, keep weights VMEM-resident (block index (0,0) every step),
        # auto-pipeline x/out DMAs, and let megacore split the "parallel" batch axis.
        grid = (B_pad // TM,)
        out_p = pl.pallas_call(
            _asc_head_kernel,
            out_shape=jax.ShapeDtypeStruct((B_pad, L_pad), dtype),
            grid_spec=pl.GridSpec(
                grid=grid,
                in_specs=[
                    pl.BlockSpec((TM, D_pad), lambda i: (i, 0)),
                    pl.BlockSpec((D_pad, H_pad), lambda i: (0, 0)),
                    pl.BlockSpec((1, H_pad), lambda i: (0, 0)),
                    pl.BlockSpec((H_pad, L_pad), lambda i: (0, 0)),
                    pl.BlockSpec((1, L_pad), lambda i: (0, 0)),
                ],
                out_specs=pl.BlockSpec((TM, L_pad), lambda i: (i, 0)),
            ),
            compiler_params=pltpu.CompilerParams(
                dimension_semantics=("parallel",)),
        )(x_p, w1_p, b1_p, w2_p, b2_p)

    return out_p[:B, :L]


def asc_head_reference(cls_features, w1, b1, w2, b2):
    h = jnp.maximum(cls_features @ w1 + b1, 0.0)
    return h @ w2 + b2


if __name__ == "__main__":
    # Small shapes consistent with the module: batch=8, input_dim=hidden_dim=32, num_labels=8.
    B, D, L = 8, 32, 8
    H = D  # hidden_dim defaults to input_dim

    key = jax.random.PRNGKey(0)
    k_x, k_w1, k_b1, k_w2, k_b2, k_big = jax.random.split(key, 6)

    cls_features = jax.random.normal(k_x, (B, D), dtype=jnp.float32)

    # Deterministic parameter init (PyTorch-style uniform bound 1/sqrt(fan_in)).
    bound1 = 1.0 / (D ** 0.5)
    w1 = jax.random.uniform(k_w1, (D, H), jnp.float32, -bound1, bound1)
    b1 = jax.random.uniform(k_b1, (H,), jnp.float32, -bound1, bound1)
    bound2 = 1.0 / (H ** 0.5)
    w2 = jax.random.uniform(k_w2, (H, L), jnp.float32, -bound2, bound2)
    b2 = jax.random.uniform(k_b2, (L,), jnp.float32, -bound2, bound2)

    # Small-batch (grid-less, single-shot) path.
    logits = asc_head_forward(cls_features, w1, b1, w2, b2)
    jax.block_until_ready(logits)
    ref = asc_head_reference(cls_features, w1, b1, w2, b2)
    assert logits.shape == (B, L)
    assert jnp.allclose(logits, ref, atol=1e-5, rtol=1e-5), "small-batch mismatch vs reference"

    # Large-batch (tiled, parallel grid over rows) path.
    B_big = 512
    x_big = jax.random.normal(k_big, (B_big, D), dtype=jnp.float32)
    logits_big = asc_head_forward(x_big, w1, b1, w2, b2, block_rows=256)
    jax.block_until_ready(logits_big)
    ref_big = asc_head_reference(x_big, w1, b1, w2, b2)
    assert logits_big.shape == (B_big, L)
    assert jnp.allclose(logits_big, ref_big, atol=1e-5, rtol=1e-5), "tiled mismatch vs reference"

    print("KERNEL_OK")
</pallas_src>

<mosaic_0001>
module attributes {stable_mosaic.version = 11 : i64} {
  func.func @_asc_head_kernel(%arg0: memref<8x128xf32, #tpu.memory_space<vmem>>, %arg1: memref<128x128xf32, #tpu.memory_space<vmem>>, %arg2: memref<1x128xf32, #tpu.memory_space<vmem>>, %arg3: memref<128x128xf32, #tpu.memory_space<vmem>>, %arg4: memref<1x128xf32, #tpu.memory_space<vmem>>, %arg5: memref<8x128xf32, #tpu.memory_space<vmem>>) attributes {dimension_semantics = [], scalar_prefetch = 0 : i64, scratch_operands = 0 : i64, tpu.core_type = #tpu.core_type<tc>} {
    %c0 = arith.constant 0 : index
    %c0_0 = arith.constant 0 : index
    %0 = vector.load %arg0[%c0, %c0_0] : memref<8x128xf32, #tpu.memory_space<vmem>>, vector<8x128xf32>
    %c0_1 = arith.constant 0 : index
    %c0_2 = arith.constant 0 : index
    %1 = vector.load %arg1[%c0_1, %c0_2] : memref<128x128xf32, #tpu.memory_space<vmem>>, vector<128x128xf32>
    %cst = arith.constant dense<0.000000e+00> : vector<8x128xf32>
    %2 = tpu.matmul %0, %1, %cst {dimension_numbers = #tpu.dot_dimension_numbers<[1], [0], [0], [1], [0, 0, 1, 1], [], []>} : vector<8x128xf32>, vector<128x128xf32>, vector<8x128xf32> -> vector<8x128xf32>
    %c0_3 = arith.constant 0 : index
    %c0_4 = arith.constant 0 : index
    %3 = vector.load %arg2[%c0_3, %c0_4] : memref<1x128xf32, #tpu.memory_space<vmem>>, vector<1x128xf32>
    %4 = vector.broadcast %3 : vector<1x128xf32> to vector<8x128xf32>
    %5 = arith.addf %2, %4 : vector<8x128xf32>
    %cst_5 = arith.constant 0.000000e+00 : f32
    %6 = vector.broadcast %cst_5 : f32 to vector<8x128xf32>
    %7 = arith.maximumf %5, %6 : vector<8x128xf32>
    %c0_6 = arith.constant 0 : index
    %c0_7 = arith.constant 0 : index
    %8 = vector.load %arg3[%c0_6, %c0_7] : memref<128x128xf32, #tpu.memory_space<vmem>>, vector<128x128xf32>
    %cst_8 = arith.constant dense<0.000000e+00> : vector<8x128xf32>
    %9 = tpu.matmul %7, %8, %cst_8 {dimension_numbers = #tpu.dot_dimension_numbers<[1], [0], [0], [1], [0, 0, 1, 1], [], []>} : vector<8x128xf32>, vector<128x128xf32>, vector<8x128xf32> -> vector<8x128xf32>
    %c0_9 = arith.constant 0 : index
    %c0_10 = arith.constant 0 : index
    %10 = vector.load %arg4[%c0_9, %c0_10] : memref<1x128xf32, #tpu.memory_space<vmem>>, vector<1x128xf32>
    %11 = vector.broadcast %10 : vector<1x128xf32> to vector<8x128xf32>
    %12 = arith.addf %9, %11 : vector<8x128xf32>
    %c0_11 = arith.constant 0 : index
    %c0_12 = arith.constant 0 : index
    %13 = vector.load %arg5[%c0_11, %c0_12] : memref<8x128xf32, #tpu.memory_space<vmem>>, vector<8x128xf32>
    tpu.vector_store %arg5[%c0_11, %c0_12], %12 {strides = array<i32>} : memref<8x128xf32, #tpu.memory_space<vmem>>, vector<8x128xf32>,
    return
  }
}

</mosaic_0001>

<bundles_post_ra>
// kernel: asc_head_forward.1
= control target key start
LH: loop header
LB: loop body
LE: loop exit
PB: predicated region body
PF: predicated region fallthrough
CT: control target
= control target key end

     0   :  { %v406_v3 = vmov 0.0|0.0   ;;  %vm407_vm0 = vmmov 0   ;;  %v408_v6 = vmov 0.0   ;;  %s573_s0 = inlined_call_operand.vmem [shape: f32[8,128], index: 0, kind: input, shape index: {}]   ;;  %s574_s1 = inlined_call_operand.vmem [shape: f32[128,128], index: 1, kind: input, shape index: {}]   ;;  %s575_s2 = inlined_call_operand.vmem [shape: f32[1,128], index: 2, kind: input, shape index: {}]   ;;  %s576_s3 = inlined_call_operand.vmem [shape: f32[128,128], index: 3, kind: input, shape index: {}]   ;;  %s577_s4 = inlined_call_operand.vmem [shape: f32[1,128], index: 4, kind: input, shape index: {}]   ;;  %s578_s5 = inlined_call_operand.hbm [shape: f32[8,128], index: 5, kind: output, shape index: {}]  }
   0x1   :  { %v22_v0 = vld [vmem:[%s574_s1] sm:$0xff]  ;;  %v23_v1 = vld [vmem:[%s574_s1 + $0x8] sm:$0xff]  ;;  %v24_v2 = vld [vmem:[%s574_s1 + $0x10] sm:$0xff]  ;;  %330 = vmatprep.subr.bf16.mxu0 %v406_v3  ;;  %292 = vmatprep.mubr.msk.f32.mxu0 %vm407_vm0, %v408_v6 }
   0x2   :  { %v331_v4 = vpack.c.bf16 %v23_v1, %v22_v0  ;;  %v25_v5 = vld [vmem:[%s574_s1 + $0x18] sm:$0xff]  ;;  %354 = vmatprep.subr.bf16.mxu1 %v406_v3  ;;  %327 = vmatprep.mubr.msk.f32.mxu1 %vm407_vm0, %v408_v6  ;;  %v26_v8 = vld [vmem:[%s574_s1 + $0x20] sm:$0xff]  ;;  %v27_v9 = vld [vmem:[%s574_s1 + $0x28] sm:$0xff] }
   0x3   :  { %v334_v7 = vpack.c.bf16 %v25_v5, %v24_v2  ;;  %v116_v10 = vld [vmem:[%s576_s3] sm:$0xff]  ;;  %v117_v11 = vld [vmem:[%s576_s3 + $0x8] sm:$0xff]  ;;  %v118_v12 = vld [vmem:[%s576_s3 + $0x10] sm:$0xff]  ;;  %v337_v14 = vpack.c.bf16 %v27_v9, %v26_v8 }
   0x4   :  { %332 = vmatpush3.bf16.msra.mxu0 %v331_v4  ;;  %v119_v13 = vld [vmem:[%s576_s3 + $0x18] sm:$0xff]  ;;  %v355_v15 = vpack.c.bf16 %v117_v11, %v116_v10  ;;  %v28_v16 = vld [vmem:[%s574_s1 + $0x30] sm:$0xff]  ;;  %v120_v19 = vld [vmem:[%s576_s3 + $0x20] sm:$0xff] }
   0x5   :  { %333 = vmatprep.subr.bf16.mxu0 %v406_v3  ;;  %v29_v17 = vld [vmem:[%s574_s1 + $0x38] sm:$0xff]  ;;  %v358_v18 = vpack.c.bf16 %v119_v13, %v118_v12  ;;  %v121_v20 = vld [vmem:[%s576_s3 + $0x28] sm:$0xff] }
   0x6   :  { %356 = vmatpush3.bf16.msra.mxu1 %v355_v15 }
   0x7   :  { %357 = vmatprep.subr.bf16.mxu1 %v406_v3 }
   0x8   :  { %335 = vmatpush3.bf16.msra.mxu0 %v334_v7 }
   0x9   :  { %336 = vmatprep.subr.bf16.mxu0 %v406_v3 }
   0xa   :  { %10 = vsyncpa [#allocation3], 0  ;;  %v340_v21 = vpack.c.bf16 %v29_v17, %v28_v16  ;;  %v30_v22 = vld [vmem:[%s574_s1 + $0x40] sm:$0xff]  ;;  %v31_v23 = vld [vmem:[%s574_s1 + $0x48] sm:$0xff]  ;;  %359 = vmatpush3.bf16.msra.mxu1 %v358_v18  ;;  %v361_v24 = vpack.c.bf16 %v121_v20, %v120_v19  ;;  %s409_s11 = smov [#allocation2]  }
   0xb   :  { %360 = vmatprep.subr.bf16.mxu1 %v406_v3  ;;  %v122_v25 = vld [vmem:[%s576_s3 + $0x30] sm:$0xff]  ;;  %v123_v26 = vld [vmem:[%s576_s3 + $0x38] sm:$0xff]  ;;  %v343_v27 = vpack.c.bf16 %v31_v23, %v30_v22  ;;  %v124_v31 = vld [vmem:[%s576_s3 + $0x40] sm:$0xff]  ;;  %s216_s12 = sshll.u32 %s409_s11, 4  ;;  %s217_s12 = int_to_ptr.vmem [resolvable:$true] %s216_s12 }
   0xc   :  { %338 = vmatpush3.bf16.msra.mxu0 %v337_v14  ;;  %v32_v28 = vld [vmem:[%s574_s1 + $0x50] sm:$0xff]  ;;  %v33_v29 = vld [vmem:[%s574_s1 + $0x58] sm:$0xff]  ;;  %v364_v30 = vpack.c.bf16 %v123_v26, %v122_v25  ;;  %v125_v32 = vld [vmem:[%s576_s3 + $0x48] sm:$0xff]  ;;  %p387_p1 = scmp.lt.s32.totalorder %s217_s12, %s217_s12 }
   0xd   :  { %339 = vmatprep.subr.bf16.mxu0 %v406_v3  ;;  %v346_v33 = vpack.c.bf16 %v33_v29, %v32_v28  ;;  %v34_v34 = vld [vmem:[%s574_s1 + $0x60] sm:$0xff]  ;;  %v35_v35 = vld [vmem:[%s574_s1 + $0x68] sm:$0xff]  ;;  %v367_v36 = vpack.c.bf16 %v125_v32, %v124_v31  ;;  %v126_v37 = vld [vmem:[%s576_s3 + $0x50] sm:$0xff] }
   0xe   :  { %362 = vmatpush3.bf16.msra.mxu1 %v361_v24  ;;  %v127_v38 = vld [vmem:[%s576_s3 + $0x58] sm:$0xff]  ;;  %v349_v39 = vpack.c.bf16 %v35_v35, %v34_v34  ;;  %v36_v40 = vld [vmem:[%s574_s1 + $0x70] sm:$0xff]  ;;  %v128_v43 = vld [vmem:[%s576_s3 + $0x60] sm:$0xff] }
   0xf   :  { %363 = vmatprep.subr.bf16.mxu1 %v406_v3  ;;  %v37_v41 = vld [vmem:[%s574_s1 + $0x78] sm:$0xff]  ;;  %v370_v42 = vpack.c.bf16 %v127_v38, %v126_v37  ;;  %v129_v44 = vld [vmem:[%s576_s3 + $0x68] sm:$0xff]  ;;  %v21_v47 = vld [vmem:[%s573_s0] sm:$0xff] }
  0x10   :  { %341 = vmatpush3.bf16.msra.mxu0 %v340_v21  ;;  %v352_v45 = vpack.c.bf16 %v37_v41, %v36_v40  ;;  %v373_v46 = vpack.c.bf16 %v129_v44, %v128_v43  ;;  %v130_v48 = vld [vmem:[%s576_s3 + $0x70] sm:$0xff]  ;;  %v131_v49 = vld [vmem:[%s576_s3 + $0x78] sm:$0xff]  ;;  %v224_v51 = vld [vmem:[%s575_s2] ss:$0 sm:$0xff]  ;;  %s382_s3 = scalar_lea.vmem %s217_s12, 128 }
  0x11   :  { %342 = vmatprep.subr.bf16.mxu0 %v406_v3  ;;  %v376_v50 = vpack.c.bf16 %v131_v49, %v130_v48  ;;  %v225_v56 = vld [vmem:[%s577_s4] ss:$0 sm:$0xff]  ;;  %p383_p0 = scmp.ne.s32.totalorder %s217_s12, %s382_s3  ;;  %p388_p2 = scmp.lt.s32.totalorder %s382_s3, %s382_s3 }
  0x12   :  { %365 = vmatpush3.bf16.msra.mxu1 %v364_v30 }
  0x13   :  { %366 = vmatprep.subr.bf16.mxu1 %v406_v3  ;;  %p389_p3 = por %p388_p2, %p387_p1 }
  0x14   :  { %344 = vmatpush3.bf16.msra.mxu0 %v343_v27 }
  0x15   :  { %345 = vmatprep.subr.bf16.mxu0 %v406_v3  ;;  %p390_p4 = pnand %p389_p3, %p383_p0 }
  0x16   :  { %368 = vmatpush3.bf16.msra.mxu1 %v367_v36 }
  0x17   :  { %369 = vmatprep.subr.bf16.mxu1 %v406_v3 }
  0x18   :  { %347 = vmatpush3.bf16.msra.mxu0 %v346_v33 }
  0x19   :  { %348 = vmatprep.subr.bf16.mxu0 %v406_v3 }
  0x1a   :  { %371 = vmatpush3.bf16.msra.mxu1 %v370_v42 }
  0x1b   :  { %372 = vmatprep.subr.bf16.mxu1 %v406_v3 }
  0x1c   :  { %350 = vmatpush3.bf16.msra.mxu0 %v349_v39 }
  0x1d   :  { %351 = vmatprep.subr.bf16.mxu0 %v406_v3 }
  0x1e   :  { %374 = vmatpush3.bf16.msra.mxu1 %v373_v46 }
  0x1f   :  { %375 = vmatprep.subr.bf16.mxu1 %v406_v3 }
  0x20   :  { %353 = vmatpush3.bf16.msra.mxu0 %v352_v45 }
  0x22   :  { %377 = vmatpush3.bf16.msra.mxu1 %v376_v50 }
  0x23   :  { %293 = vmatmul.mubr.f32.vlgmr.msra.gmra.mrb[0].mxu0 %v21_v47 }
  0xf6   :  { %v111_v52 = vpop.f32.mrb[0].mxu0 }
  0xf7   :  { %v112_v53 = vadd.f32 %v224_v51, %v111_v52  ;;  %v294_v54 = vpop.f32.mrb[1].mxu0 }
  0xf9   :  { %v115_v55 = vmax.f32 %v112_v53, 0.0 }
  0xfb   :  { %328 = vmatmul.mubr.f32.vlgmr.msra.gmra.mrb[0].mxu1 %v115_v55 }
 0x1ce   :  { %v205_v57 = vpop.f32.mrb[0].mxu1 }
 0x1cf   :  { %v206_v58 = vadd.f32 %v225_v56, %v205_v57  ;;  %v329_v59 = vpop.f32.mrb[1].mxu1 }
 0x1d1   :  { %209 = vst [vmem:[#allocation2] sm:$0xff] %v206_v58 }
 0x1d2   :  { %393 = shalt.err (!%p390_p4)
}
 0x1d3   :  { %s394_s14 = scalar_lea.hbm %s578_s5, 128 }
 0x1d4   :  { %p395_p5 = scmp.ne.s32.totalorder %s578_s5, %s394_s14  ;;  %p398_p6 = scmp.lt.u32.totalorder %s394_s14, %s578_s5 }
 0x1d6   :  { %p400_p7 = pnand %p398_p6, %p395_p5 }
 0x1d8   :  { %403 = shalt.err (!%p400_p7)
}
 0x1d9   :  { %219 = dma.vmem_to_hbm [thread:$0]  %s217_s12, 128, %s578_s5, [#allocation3]  }
 0x1da   :  { %404 = dma.done.wait [#allocation3], 128  }
 0x1db   :  { %405 = vsyncadd [#allocation3], 4294967168 }
 0x1dc   :  { %223 = vsyncpa [#allocation3], 1 }

</bundles_post_ra>
